<compile_context>
chip_gen: v7x
topology: tpu7x:2x2x1
jax: 0.10.0
libtpu: 0.0.40
codegen_flags: <defaults>
</compile_context>

<pallas_src>
import math

import jax
import jax.numpy as jnp
from jax import lax
from jax.experimental import pallas as pl
from jax.experimental.pallas import tpu as pltpu

LANES = 128      # TPU lane width
SUB = 8          # f32 sublane count; one chunk = one (8, 128) vreg of indexes
TM_MAX = 4096    # max rows per block (4096*128*4 B = 2 MiB int32, double-buffered)


def _make_entropy_kernel(num_symbols_pow2, tm):
    """Per-block kernel: gather-sum of the log-pmf via a binary select tree."""
    assert tm % SUB == 0 and tm >= SUB
    n_chunks = tm // SUB
    nbits = max(num_symbols_pow2.bit_length() - 1, 0)   # log2(Lp)

    def kernel(idx_ref, lp_ref, out_ref):
        def chunk(c, acc):
            if isinstance(c, int):
                start = c * SUB
            else:
                start = pl.multiple_of(c * SUB, SUB)
            idx = idx_ref[pl.ds(start, SUB), :]                  # (8,128) int32
            # Bit predicates of the symbol index, computed once per chunk.
            bits = [(idx & (1 << j)) != 0 for j in range(nbits)]

            def rec(lo, span):
                # Select tree over lp[lo : lo+span]; lo is span-aligned so bit
                # log2(span//2) splits the range exactly in half.  DFS order
                # keeps the live vreg set ~tree-depth small.
                if span == 1:
                    return lp_ref[lo]                            # (8,128) f32
                half = span // 2
                left = rec(lo, half)
                right = rec(lo + half, half)
                return jnp.where(bits[half.bit_length() - 1], right, left)

            return acc + rec(0, num_symbols_pow2)

        acc = jnp.zeros((SUB, LANES), jnp.float32)
        if n_chunks == 1:
            acc = chunk(0, acc)
        else:
            acc = lax.fori_loop(0, n_chunks, chunk, acc, unroll=2)
        out_ref[...] = acc[None]

    return kernel


def discrete_unconditional_entropy_bits(indexes, log_pmf, *, tm_max=TM_MAX):
    """Pallas equivalent of DiscreteUnconditionalEntropyModel.forward(indexes)."""
    num_symbols = int(log_pmf.shape[0])
    assert num_symbols >= 1
    # NOTE: like the PyTorch gather, indexes are assumed to lie in [0, L).

    lp32 = log_pmf.astype(jnp.float32)
    n_pow2 = 1 << max((num_symbols - 1).bit_length(), 0)
    # Zero-padded, sublane/lane pre-broadcast table (Lp, 8, 128) f32 (a few
    # hundred KiB); leaf operands of the select tree become plain vreg loads.
    lp_pad = jnp.zeros((n_pow2,), jnp.float32).at[:num_symbols].set(lp32)
    lp_tbl = jnp.broadcast_to(lp_pad[:, None, None], (n_pow2, SUB, LANES))

    flat = indexes.reshape(-1).astype(jnp.int32)   # no-op if already int32
    n = flat.shape[0]
    rows = ((pl.cdiv(n, LANES) + 7) // 8) * 8      # sublane-aligned row count

    tm_max = max(SUB, (int(tm_max) // SUB) * SUB)
    # >= ~4 blocks when the input is big enough (both v7x TCs get work via the
    # "parallel" grid axis), capped at TM_MAX to bound VMEM and amortize the
    # per-step grid overhead on the single-TC chips.
    tm = max(SUB, min(tm_max, ((pl.cdiv(rows, 4) + 7) // 8) * 8))
    rows_pad = ((rows + tm - 1) // tm) * tm
    grid = (rows_pad // tm,)

    pad = rows_pad * LANES - n
    if pad:                                        # pad with symbol 0 (valid);
        flat = jnp.pad(flat, (0, pad))             # contribution removed below
    idx2d = flat.reshape(rows_pad, LANES)

    partials = pl.pallas_call(
        _make_entropy_kernel(n_pow2, tm),
        out_shape=jax.ShapeDtypeStruct((grid[0], SUB, LANES), jnp.float32),
        grid=grid,
        in_specs=[
            pl.BlockSpec((tm, LANES), lambda i: (i, 0)),              # symbols
            pl.BlockSpec((n_pow2, SUB, LANES), lambda i: (0, 0, 0)),  # table
        ],
        out_specs=pl.BlockSpec((1, SUB, LANES), lambda i: (i, 0, 0)),
        compiler_params=pltpu.CompilerParams(
            dimension_semantics=("parallel",)),    # independent blocks
    )(idx2d, lp_tbl)

    total = jnp.sum(partials)
    if pad:
        total = total - jnp.float32(pad) * lp32[0]
    return total * jnp.float32(-1.0 / math.log(2.0))


# TODO(synk): compress/decompress (rANS range coder) and the quantized-CDF
# table construction are host-side, inherently sequential ops with no Pallas
# equivalent; only forward() is implemented here.

if __name__ == "__main__":
    key = jax.random.PRNGKey(0)
    k_logits, k_idx, k_idx2, k_logits2, k_idx3 = jax.random.split(key, 5)

    def ref_bits(idx, lp):
        # Pure-JAX reference: prior.log_prob(indexes) == log_pmf[indexes]
        return jnp.sum(lp[idx]) / (-math.log(2.0))

    # --- power-of-two symbol count --------------------------------------
    L = 64
    log_pmf = jax.nn.log_softmax(
        jax.random.normal(k_logits, (L,), dtype=jnp.float32))

    # Small NCHW index tensor, consistent with the module's forward().
    indexes = jax.random.randint(k_idx, (2, 4, 16, 16), 0, L, dtype=jnp.int32)
    bits = jax.block_until_ready(
        discrete_unconditional_entropy_bits(indexes, log_pmf))
    assert jnp.allclose(bits, ref_bits(indexes, log_pmf), rtol=1e-4, atol=1e-3), \
        (bits, ref_bits(indexes, log_pmf))

    # Larger input: exercises the in-block chunk loop and a 4-block grid.
    indexes2 = jax.random.randint(k_idx2, (2, 4, 64, 64), 0, L, dtype=jnp.int32)
    bits2 = jax.block_until_ready(
        discrete_unconditional_entropy_bits(indexes2, log_pmf))
    assert jnp.allclose(bits2, ref_bits(indexes2, log_pmf), rtol=1e-4, atol=1e-3), \
        (bits2, ref_bits(indexes2, log_pmf))

    # Small block size: ragged grid -> wrapper-side zero-symbol padding plus
    # exact correction (no in-kernel masking), 7 "parallel" blocks.
    bits3 = jax.block_until_ready(
        discrete_unconditional_entropy_bits(indexes2, log_pmf, tm_max=40))
    assert jnp.allclose(bits3, ref_bits(indexes2, log_pmf), rtol=1e-4, atol=1e-3), \
        (bits3, ref_bits(indexes2, log_pmf))

    # --- non-power-of-two symbol count (zero-padded table) + heavy padding --
    L2 = 10
    log_pmf2 = jax.nn.log_softmax(
        jax.random.normal(k_logits2, (L2,), dtype=jnp.float32))
    indexes3 = jax.random.randint(k_idx3, (3, 5, 7), 0, L2, dtype=jnp.int32)
    bits4 = jax.block_until_ready(
        discrete_unconditional_entropy_bits(indexes3, log_pmf2))
    assert jnp.allclose(bits4, ref_bits(indexes3, log_pmf2), rtol=1e-4, atol=1e-3), \
        (bits4, ref_bits(indexes3, log_pmf2))

    print("KERNEL_OK")
</pallas_src>

<mosaic_0001>
module attributes {stable_mosaic.version = 11 : i64} {
  func.func @kernel(%arg0: i32, %arg1: memref<8x128xi32, #tpu.memory_space<vmem>>, %arg2: memref<64x8x128xf32, #tpu.memory_space<vmem>>, %arg3: memref<1x8x128xf32, #tpu.memory_space<vmem>>) attributes {dimension_semantics = [#tpu.dimension_semantics<parallel>], iteration_bounds = array<i64: 2>, scalar_prefetch = 0 : i64, scratch_operands = 0 : i64, tpu.core_type = #tpu.core_type<tc>, window_params = [{transform_indices = @transform_0, window_bounds = array<i64: 8, 128>}, {pipeline_mode = #tpu.pipeline_mode<synchronous>, transform_indices = @transform_1, window_bounds = array<i64: 64, 8, 128>}, {transform_indices = @transform_2, window_bounds = array<i64: 1, 8, 128>}]} {
    %cst = arith.constant 0.000000e+00 : f32
    %0 = vector.broadcast %cst : f32 to vector<8x128xf32>
    %c0 = arith.constant 0 : index
    %c0_0 = arith.constant 0 : index
    %1 = vector.load %arg1[%c0, %c0_0] : memref<8x128xi32, #tpu.memory_space<vmem>>, vector<8x128xi32>
    %c1_i32 = arith.constant 1 : i32
    %2 = vector.broadcast %c1_i32 : i32 to vector<8x128xi32>
    %3 = arith.andi %1, %2 : vector<8x128xi32>
    %c0_i32 = arith.constant 0 : i32
    %4 = vector.broadcast %c0_i32 : i32 to vector<8x128xi32>
    %5 = arith.cmpi ne, %3, %4 : vector<8x128xi32>
    %c2_i32 = arith.constant 2 : i32
    %6 = vector.broadcast %c2_i32 : i32 to vector<8x128xi32>
    %7 = arith.andi %1, %6 : vector<8x128xi32>
    %c0_i32_1 = arith.constant 0 : i32
    %8 = vector.broadcast %c0_i32_1 : i32 to vector<8x128xi32>
    %9 = arith.cmpi ne, %7, %8 : vector<8x128xi32>
    %c4_i32 = arith.constant 4 : i32
    %10 = vector.broadcast %c4_i32 : i32 to vector<8x128xi32>
    %11 = arith.andi %1, %10 : vector<8x128xi32>
    %c0_i32_2 = arith.constant 0 : i32
    %12 = vector.broadcast %c0_i32_2 : i32 to vector<8x128xi32>
    %13 = arith.cmpi ne, %11, %12 : vector<8x128xi32>
    %c8_i32 = arith.constant 8 : i32
    %14 = vector.broadcast %c8_i32 : i32 to vector<8x128xi32>
    %15 = arith.andi %1, %14 : vector<8x128xi32>
    %c0_i32_3 = arith.constant 0 : i32
    %16 = vector.broadcast %c0_i32_3 : i32 to vector<8x128xi32>
    %17 = arith.cmpi ne, %15, %16 : vector<8x128xi32>
    %c16_i32 = arith.constant 16 : i32
    %18 = vector.broadcast %c16_i32 : i32 to vector<8x128xi32>
    %19 = arith.andi %1, %18 : vector<8x128xi32>
    %c0_i32_4 = arith.constant 0 : i32
    %20 = vector.broadcast %c0_i32_4 : i32 to vector<8x128xi32>
    %21 = arith.cmpi ne, %19, %20 : vector<8x128xi32>
    %c32_i32 = arith.constant 32 : i32
    %22 = vector.broadcast %c32_i32 : i32 to vector<8x128xi32>
    %23 = arith.andi %1, %22 : vector<8x128xi32>
    %c0_i32_5 = arith.constant 0 : i32
    %24 = vector.broadcast %c0_i32_5 : i32 to vector<8x128xi32>
    %25 = arith.cmpi ne, %23, %24 : vector<8x128xi32>
    %c0_6 = arith.constant 0 : index
    %c0_7 = arith.constant 0 : index
    %c0_8 = arith.constant 0 : index
    %26 = vector.load %arg2[%c0_6, %c0_7, %c0_8] : memref<64x8x128xf32, #tpu.memory_space<vmem>>, vector<1x8x128xf32>
    %27 = vector.shape_cast %26 : vector<1x8x128xf32> to vector<8x128xf32>
    %c1 = arith.constant 1 : index
    %c0_9 = arith.constant 0 : index
    %c0_10 = arith.constant 0 : index
    %28 = vector.load %arg2[%c1, %c0_9, %c0_10] : memref<64x8x128xf32, #tpu.memory_space<vmem>>, vector<1x8x128xf32>
    %29 = vector.shape_cast %28 : vector<1x8x128xf32> to vector<8x128xf32>
    %30 = arith.select %5, %29, %27 : vector<8x128xi1>, vector<8x128xf32>
    %c2 = arith.constant 2 : index
    %c0_11 = arith.constant 0 : index
    %c0_12 = arith.constant 0 : index
    %31 = vector.load %arg2[%c2, %c0_11, %c0_12] : memref<64x8x128xf32, #tpu.memory_space<vmem>>, vector<1x8x128xf32>
    %32 = vector.shape_cast %31 : vector<1x8x128xf32> to vector<8x128xf32>
    %c3 = arith.constant 3 : index
    %c0_13 = arith.constant 0 : index
    %c0_14 = arith.constant 0 : index
    %33 = vector.load %arg2[%c3, %c0_13, %c0_14] : memref<64x8x128xf32, #tpu.memory_space<vmem>>, vector<1x8x128xf32>
    %34 = vector.shape_cast %33 : vector<1x8x128xf32> to vector<8x128xf32>
    %35 = arith.select %5, %34, %32 : vector<8x128xi1>, vector<8x128xf32>
    %36 = arith.select %9, %35, %30 : vector<8x128xi1>, vector<8x128xf32>
    %c4 = arith.constant 4 : index
    %c0_15 = arith.constant 0 : index
    %c0_16 = arith.constant 0 : index
    %37 = vector.load %arg2[%c4, %c0_15, %c0_16] : memref<64x8x128xf32, #tpu.memory_space<vmem>>, vector<1x8x128xf32>
    %38 = vector.shape_cast %37 : vector<1x8x128xf32> to vector<8x128xf32>
    %c5 = arith.constant 5 : index
    %c0_17 = arith.constant 0 : index
    %c0_18 = arith.constant 0 : index
    %39 = vector.load %arg2[%c5, %c0_17, %c0_18] : memref<64x8x128xf32, #tpu.memory_space<vmem>>, vector<1x8x128xf32>
    %40 = vector.shape_cast %39 : vector<1x8x128xf32> to vector<8x128xf32>
    %41 = arith.select %5, %40, %38 : vector<8x128xi1>, vector<8x128xf32>
    %c6 = arith.constant 6 : index
    %c0_19 = arith.constant 0 : index
    %c0_20 = arith.constant 0 : index
    %42 = vector.load %arg2[%c6, %c0_19, %c0_20] : memref<64x8x128xf32, #tpu.memory_space<vmem>>, vector<1x8x128xf32>
    %43 = vector.shape_cast %42 : vector<1x8x128xf32> to vector<8x128xf32>
    %c7 = arith.constant 7 : index
    %c0_21 = arith.constant 0 : index
    %c0_22 = arith.constant 0 : index
    %44 = vector.load %arg2[%c7, %c0_21, %c0_22] : memref<64x8x128xf32, #tpu.memory_space<vmem>>, vector<1x8x128xf32>
    %45 = vector.shape_cast %44 : vector<1x8x128xf32> to vector<8x128xf32>
    %46 = arith.select %5, %45, %43 : vector<8x128xi1>, vector<8x128xf32>
    %47 = arith.select %9, %46, %41 : vector<8x128xi1>, vector<8x128xf32>
    %48 = arith.select %13, %47, %36 : vector<8x128xi1>, vector<8x128xf32>
    %c8 = arith.constant 8 : index
    %c0_23 = arith.constant 0 : index
    %c0_24 = arith.constant 0 : index
    %49 = vector.load %arg2[%c8, %c0_23, %c0_24] : memref<64x8x128xf32, #tpu.memory_space<vmem>>, vector<1x8x128xf32>
    %50 = vector.shape_cast %49 : vector<1x8x128xf32> to vector<8x128xf32>
    %c9 = arith.constant 9 : index
    %c0_25 = arith.constant 0 : index
    %c0_26 = arith.constant 0 : index
    %51 = vector.load %arg2[%c9, %c0_25, %c0_26] : memref<64x8x128xf32, #tpu.memory_space<vmem>>, vector<1x8x128xf32>
    %52 = vector.shape_cast %51 : vector<1x8x128xf32> to vector<8x128xf32>
    %53 = arith.select %5, %52, %50 : vector<8x128xi1>, vector<8x128xf32>
    %c10 = arith.constant 10 : index
    %c0_27 = arith.constant 0 : index
    %c0_28 = arith.constant 0 : index
    %54 = vector.load %arg2[%c10, %c0_27, %c0_28] : memref<64x8x128xf32, #tpu.memory_space<vmem>>, vector<1x8x128xf32>
    %55 = vector.shape_cast %54 : vector<1x8x128xf32> to vector<8x128xf32>
    %c11 = arith.constant 11 : index
    %c0_29 = arith.constant 0 : index
    %c0_30 = arith.constant 0 : index
    %56 = vector.load %arg2[%c11, %c0_29, %c0_30] : memref<64x8x128xf32, #tpu.memory_space<vmem>>, vector<1x8x128xf32>
    %57 = vector.shape_cast %56 : vector<1x8x128xf32> to vector<8x128xf32>
    %58 = arith.select %5, %57, %55 : vector<8x128xi1>, vector<8x128xf32>
    %59 = arith.select %9, %58, %53 : vector<8x128xi1>, vector<8x128xf32>
    %c12 = arith.constant 12 : index
    %c0_31 = arith.constant 0 : index
    %c0_32 = arith.constant 0 : index
    %60 = vector.load %arg2[%c12, %c0_31, %c0_32] : memref<64x8x128xf32, #tpu.memory_space<vmem>>, vector<1x8x128xf32>
    %61 = vector.shape_cast %60 : vector<1x8x128xf32> to vector<8x128xf32>
    %c13 = arith.constant 13 : index
    %c0_33 = arith.constant 0 : index
    %c0_34 = arith.constant 0 : index
    %62 = vector.load %arg2[%c13, %c0_33, %c0_34] : memref<64x8x128xf32, #tpu.memory_space<vmem>>, vector<1x8x128xf32>
    %63 = vector.shape_cast %62 : vector<1x8x128xf32> to vector<8x128xf32>
    %64 = arith.select %5, %63, %61 : vector<8x128xi1>, vector<8x128xf32>
    %c14 = arith.constant 14 : index
    %c0_35 = arith.constant 0 : index
    %c0_36 = arith.constant 0 : index
    %65 = vector.load %arg2[%c14, %c0_35, %c0_36] : memref<64x8x128xf32, #tpu.memory_space<vmem>>, vector<1x8x128xf32>
    %66 = vector.shape_cast %65 : vector<1x8x128xf32> to vector<8x128xf32>
    %c15 = arith.constant 15 : index
    %c0_37 = arith.constant 0 : index
    %c0_38 = arith.constant 0 : index
    %67 = vector.load %arg2[%c15, %c0_37, %c0_38] : memref<64x8x128xf32, #tpu.memory_space<vmem>>, vector<1x8x128xf32>
    %68 = vector.shape_cast %67 : vector<1x8x128xf32> to vector<8x128xf32>
    %69 = arith.select %5, %68, %66 : vector<8x128xi1>, vector<8x128xf32>
    %70 = arith.select %9, %69, %64 : vector<8x128xi1>, vector<8x128xf32>
    %71 = arith.select %13, %70, %59 : vector<8x128xi1>, vector<8x128xf32>
    %72 = arith.select %17, %71, %48 : vector<8x128xi1>, vector<8x128xf32>
    %c16 = arith.constant 16 : index
    %c0_39 = arith.constant 0 : index
    %c0_40 = arith.constant 0 : index
    %73 = vector.load %arg2[%c16, %c0_39, %c0_40] : memref<64x8x128xf32, #tpu.memory_space<vmem>>, vector<1x8x128xf32>
    %74 = vector.shape_cast %73 : vector<1x8x128xf32> to vector<8x128xf32>
    %c17 = arith.constant 17 : index
    %c0_41 = arith.constant 0 : index
    %c0_42 = arith.constant 0 : index
    %75 = vector.load %arg2[%c17, %c0_41, %c0_42] : memref<64x8x128xf32, #tpu.memory_space<vmem>>, vector<1x8x128xf32>
    %76 = vector.shape_cast %75 : vector<1x8x128xf32> to vector<8x128xf32>
    %77 = arith.select %5, %76, %74 : vector<8x128xi1>, vector<8x128xf32>
    %c18 = arith.constant 18 : index
    %c0_43 = arith.constant 0 : index
    %c0_44 = arith.constant 0 : index
    %78 = vector.load %arg2[%c18, %c0_43, %c0_44] : memref<64x8x128xf32, #tpu.memory_space<vmem>>, vector<1x8x128xf32>
    %79 = vector.shape_cast %78 : vector<1x8x128xf32> to vector<8x128xf32>
    %c19 = arith.constant 19 : index
    %c0_45 = arith.constant 0 : index
    %c0_46 = arith.constant 0 : index
    %80 = vector.load %arg2[%c19, %c0_45, %c0_46] : memref<64x8x128xf32, #tpu.memory_space<vmem>>, vector<1x8x128xf32>
    %81 = vector.shape_cast %80 : vector<1x8x128xf32> to vector<8x128xf32>
    %82 = arith.select %5, %81, %79 : vector<8x128xi1>, vector<8x128xf32>
    %83 = arith.select %9, %82, %77 : vector<8x128xi1>, vector<8x128xf32>
    %c20 = arith.constant 20 : index
    %c0_47 = arith.constant 0 : index
    %c0_48 = arith.constant 0 : index
    %84 = vector.load %arg2[%c20, %c0_47, %c0_48] : memref<64x8x128xf32, #tpu.memory_space<vmem>>, vector<1x8x128xf32>
    %85 = vector.shape_cast %84 : vector<1x8x128xf32> to vector<8x128xf32>
    %c21 = arith.constant 21 : index
    %c0_49 = arith.constant 0 : index
    %c0_50 = arith.constant 0 : index
    %86 = vector.load %arg2[%c21, %c0_49, %c0_50] : memref<64x8x128xf32, #tpu.memory_space<vmem>>, vector<1x8x128xf32>
    %87 = vector.shape_cast %86 : vector<1x8x128xf32> to vector<8x128xf32>
    %88 = arith.select %5, %87, %85 : vector<8x128xi1>, vector<8x128xf32>
    %c22 = arith.constant 22 : index
    %c0_51 = arith.constant 0 : index
    %c0_52 = arith.constant 0 : index
    %89 = vector.load %arg2[%c22, %c0_51, %c0_52] : memref<64x8x128xf32, #tpu.memory_space<vmem>>, vector<1x8x128xf32>
    %90 = vector.shape_cast %89 : vector<1x8x128xf32> to vector<8x128xf32>
    %c23 = arith.constant 23 : index
    %c0_53 = arith.constant 0 : index
    %c0_54 = arith.constant 0 : index
    %91 = vector.load %arg2[%c23, %c0_53, %c0_54] : memref<64x8x128xf32, #tpu.memory_space<vmem>>, vector<1x8x128xf32>
    %92 = vector.shape_cast %91 : vector<1x8x128xf32> to vector<8x128xf32>
    %93 = arith.select %5, %92, %90 : vector<8x128xi1>, vector<8x128xf32>
    %94 = arith.select %9, %93, %88 : vector<8x128xi1>, vector<8x128xf32>
    %95 = arith.select %13, %94, %83 : vector<8x128xi1>, vector<8x128xf32>
    %c24 = arith.constant 24 : index
    %c0_55 = arith.constant 0 : index
    %c0_56 = arith.constant 0 : index
    %96 = vector.load %arg2[%c24, %c0_55, %c0_56] : memref<64x8x128xf32, #tpu.memory_space<vmem>>, vector<1x8x128xf32>
    %97 = vector.shape_cast %96 : vector<1x8x128xf32> to vector<8x128xf32>
    %c25 = arith.constant 25 : index
    %c0_57 = arith.constant 0 : index
    %c0_58 = arith.constant 0 : index
    %98 = vector.load %arg2[%c25, %c0_57, %c0_58] : memref<64x8x128xf32, #tpu.memory_space<vmem>>, vector<1x8x128xf32>
    %99 = vector.shape_cast %98 : vector<1x8x128xf32> to vector<8x128xf32>
    %100 = arith.select %5, %99, %97 : vector<8x128xi1>, vector<8x128xf32>
    %c26 = arith.constant 26 : index
    %c0_59 = arith.constant 0 : index
    %c0_60 = arith.constant 0 : index
    %101 = vector.load %arg2[%c26, %c0_59, %c0_60] : memref<64x8x128xf32, #tpu.memory_space<vmem>>, vector<1x8x128xf32>
    %102 = vector.shape_cast %101 : vector<1x8x128xf32> to vector<8x128xf32>
    %c27 = arith.constant 27 : index
    %c0_61 = arith.constant 0 : index
    %c0_62 = arith.constant 0 : index
    %103 = vector.load %arg2[%c27, %c0_61, %c0_62] : memref<64x8x128xf32, #tpu.memory_space<vmem>>, vector<1x8x128xf32>
    %104 = vector.shape_cast %103 : vector<1x8x128xf32> to vector<8x128xf32>
    %105 = arith.select %5, %104, %102 : vector<8x128xi1>, vector<8x128xf32>
    %106 = arith.select %9, %105, %100 : vector<8x128xi1>, vector<8x128xf32>
    %c28 = arith.constant 28 : index
    %c0_63 = arith.constant 0 : index
    %c0_64 = arith.constant 0 : index
    %107 = vector.load %arg2[%c28, %c0_63, %c0_64] : memref<64x8x128xf32, #tpu.memory_space<vmem>>, vector<1x8x128xf32>
    %108 = vector.shape_cast %107 : vector<1x8x128xf32> to vector<8x128xf32>
    %c29 = arith.constant 29 : index
    %c0_65 = arith.constant 0 : index
    %c0_66 = arith.constant 0 : index
    %109 = vector.load %arg2[%c29, %c0_65, %c0_66] : memref<64x8x128xf32, #tpu.memory_space<vmem>>, vector<1x8x128xf32>
    %110 = vector.shape_cast %109 : vector<1x8x128xf32> to vector<8x128xf32>
    %111 = arith.select %5, %110, %108 : vector<8x128xi1>, vector<8x128xf32>
    %c30 = arith.constant 30 : index
    %c0_67 = arith.constant 0 : index
    %c0_68 = arith.constant 0 : index
    %112 = vector.load %arg2[%c30, %c0_67, %c0_68] : memref<64x8x128xf32, #tpu.memory_space<vmem>>, vector<1x8x128xf32>
    %113 = vector.shape_cast %112 : vector<1x8x128xf32> to vector<8x128xf32>
    %c31 = arith.constant 31 : index
    %c0_69 = arith.constant 0 : index
    %c0_70 = arith.constant 0 : index
    %114 = vector.load %arg2[%c31, %c0_69, %c0_70] : memref<64x8x128xf32, #tpu.memory_space<vmem>>, vector<1x8x128xf32>
    %115 = vector.shape_cast %114 : vector<1x8x128xf32> to vector<8x128xf32>
    %116 = arith.select %5, %115, %113 : vector<8x128xi1>, vector<8x128xf32>
    %117 = arith.select %9, %116, %111 : vector<8x128xi1>, vector<8x128xf32>
    %118 = arith.select %13, %117, %106 : vector<8x128xi1>, vector<8x128xf32>
    %119 = arith.select %17, %118, %95 : vector<8x128xi1>, vector<8x128xf32>
    %120 = arith.select %21, %119, %72 : vector<8x128xi1>, vector<8x128xf32>
    %c32 = arith.constant 32 : index
    %c0_71 = arith.constant 0 : index
    %c0_72 = arith.constant 0 : index
    %121 = vector.load %arg2[%c32, %c0_71, %c0_72] : memref<64x8x128xf32, #tpu.memory_space<vmem>>, vector<1x8x128xf32>
    %122 = vector.shape_cast %121 : vector<1x8x128xf32> to vector<8x128xf32>
    %c33 = arith.constant 33 : index
    %c0_73 = arith.constant 0 : index
    %c0_74 = arith.constant 0 : index
    %123 = vector.load %arg2[%c33, %c0_73, %c0_74] : memref<64x8x128xf32, #tpu.memory_space<vmem>>, vector<1x8x128xf32>
    %124 = vector.shape_cast %123 : vector<1x8x128xf32> to vector<8x128xf32>
    %125 = arith.select %5, %124, %122 : vector<8x128xi1>, vector<8x128xf32>
    %c34 = arith.constant 34 : index
    %c0_75 = arith.constant 0 : index
    %c0_76 = arith.constant 0 : index
    %126 = vector.load %arg2[%c34, %c0_75, %c0_76] : memref<64x8x128xf32, #tpu.memory_space<vmem>>, vector<1x8x128xf32>
    %127 = vector.shape_cast %126 : vector<1x8x128xf32> to vector<8x128xf32>
    %c35 = arith.constant 35 : index
    %c0_77 = arith.constant 0 : index
    %c0_78 = arith.constant 0 : index
    %128 = vector.load %arg2[%c35, %c0_77, %c0_78] : memref<64x8x128xf32, #tpu.memory_space<vmem>>, vector<1x8x128xf32>
    %129 = vector.shape_cast %128 : vector<1x8x128xf32> to vector<8x128xf32>
    %130 = arith.select %5, %129, %127 : vector<8x128xi1>, vector<8x128xf32>
    %131 = arith.select %9, %130, %125 : vector<8x128xi1>, vector<8x128xf32>
    %c36 = arith.constant 36 : index
    %c0_79 = arith.constant 0 : index
    %c0_80 = arith.constant 0 : index
    %132 = vector.load %arg2[%c36, %c0_79, %c0_80] : memref<64x8x128xf32, #tpu.memory_space<vmem>>, vector<1x8x128xf32>
    %133 = vector.shape_cast %132 : vector<1x8x128xf32> to vector<8x128xf32>
    %c37 = arith.constant 37 : index
    %c0_81 = arith.constant 0 : index
    %c0_82 = arith.constant 0 : index
    %134 = vector.load %arg2[%c37, %c0_81, %c0_82] : memref<64x8x128xf32, #tpu.memory_space<vmem>>, vector<1x8x128xf32>
    %135 = vector.shape_cast %134 : vector<1x8x128xf32> to vector<8x128xf32>
    %136 = arith.select %5, %135, %133 : vector<8x128xi1>, vector<8x128xf32>
    %c38 = arith.constant 38 : index
    %c0_83 = arith.constant 0 : index
    %c0_84 = arith.constant 0 : index
    %137 = vector.load %arg2[%c38, %c0_83, %c0_84] : memref<64x8x128xf32, #tpu.memory_space<vmem>>, vector<1x8x128xf32>
    %138 = vector.shape_cast %137 : vector<1x8x128xf32> to vector<8x128xf32>
    %c39 = arith.constant 39 : index
    %c0_85 = arith.constant 0 : index
    %c0_86 = arith.constant 0 : index
    %139 = vector.load %arg2[%c39, %c0_85, %c0_86] : memref<64x8x128xf32, #tpu.memory_space<vmem>>, vector<1x8x128xf32>
    %140 = vector.shape_cast %139 : vector<1x8x128xf32> to vector<8x128xf32>
    %141 = arith.select %5, %140, %138 : vector<8x128xi1>, vector<8x128xf32>
    %142 = arith.select %9, %141, %136 : vector<8x128xi1>, vector<8x128xf32>
    %143 = arith.select %13, %142, %131 : vector<8x128xi1>, vector<8x128xf32>
    %c40 = arith.constant 40 : index
    %c0_87 = arith.constant 0 : index
    %c0_88 = arith.constant 0 : index
    %144 = vector.load %arg2[%c40, %c0_87, %c0_88] : memref<64x8x128xf32, #tpu.memory_space<vmem>>, vector<1x8x128xf32>
    %145 = vector.shape_cast %144 : vector<1x8x128xf32> to vector<8x128xf32>
    %c41 = arith.constant 41 : index
    %c0_89 = arith.constant 0 : index
    %c0_90 = arith.constant 0 : index
    %146 = vector.load %arg2[%c41, %c0_89, %c0_90] : memref<64x8x128xf32, #tpu.memory_space<vmem>>, vector<1x8x128xf32>
    %147 = vector.shape_cast %146 : vector<1x8x128xf32> to vector<8x128xf32>
    %148 = arith.select %5, %147, %145 : vector<8x128xi1>, vector<8x128xf32>
    %c42 = arith.constant 42 : index
    %c0_91 = arith.constant 0 : index
    %c0_92 = arith.constant 0 : index
    %149 = vector.load %arg2[%c42, %c0_91, %c0_92] : memref<64x8x128xf32, #tpu.memory_space<vmem>>, vector<1x8x128xf32>
    %150 = vector.shape_cast %149 : vector<1x8x128xf32> to vector<8x128xf32>
    %c43 = arith.constant 43 : index
    %c0_93 = arith.constant 0 : index
    %c0_94 = arith.constant 0 : index
    %151 = vector.load %arg2[%c43, %c0_93, %c0_94] : memref<64x8x128xf32, #tpu.memory_space<vmem>>, vector<1x8x128xf32>
    %152 = vector.shape_cast %151 : vector<1x8x128xf32> to vector<8x128xf32>
    %153 = arith.select %5, %152, %150 : vector<8x128xi1>, vector<8x128xf32>
    %154 = arith.select %9, %153, %148 : vector<8x128xi1>, vector<8x128xf32>
    %c44 = arith.constant 44 : index
    %c0_95 = arith.constant 0 : index
    %c0_96 = arith.constant 0 : index
    %155 = vector.load %arg2[%c44, %c0_95, %c0_96] : memref<64x8x128xf32, #tpu.memory_space<vmem>>, vector<1x8x128xf32>
    %156 = vector.shape_cast %155 : vector<1x8x128xf32> to vector<8x128xf32>
    %c45 = arith.constant 45 : index
    %c0_97 = arith.constant 0 : index
    %c0_98 = arith.constant 0 : index
    %157 = vector.load %arg2[%c45, %c0_97, %c0_98] : memref<64x8x128xf32, #tpu.memory_space<vmem>>, vector<1x8x128xf32>
    %158 = vector.shape_cast %157 : vector<1x8x128xf32> to vector<8x128xf32>
    %159 = arith.select %5, %158, %156 : vector<8x128xi1>, vector<8x128xf32>
    %c46 = arith.constant 46 : index
    %c0_99 = arith.constant 0 : index
    %c0_100 = arith.constant 0 : index
    %160 = vector.load %arg2[%c46, %c0_99, %c0_100] : memref<64x8x128xf32, #tpu.memory_space<vmem>>, vector<1x8x128xf32>
    %161 = vector.shape_cast %160 : vector<1x8x128xf32> to vector<8x128xf32>
    %c47 = arith.constant 47 : index
    %c0_101 = arith.constant 0 : index
    %c0_102 = arith.constant 0 : index
    %162 = vector.load %arg2[%c47, %c0_101, %c0_102] : memref<64x8x128xf32, #tpu.memory_space<vmem>>, vector<1x8x128xf32>
    %163 = vector.shape_cast %162 : vector<1x8x128xf32> to vector<8x128xf32>
    %164 = arith.select %5, %163, %161 : vector<8x128xi1>, vector<8x128xf32>
    %165 = arith.select %9, %164, %159 : vector<8x128xi1>, vector<8x128xf32>
    %166 = arith.select %13, %165, %154 : vector<8x128xi1>, vector<8x128xf32>
    %167 = arith.select %17, %166, %143 : vector<8x128xi1>, vector<8x128xf32>
    %c48 = arith.constant 48 : index
    %c0_103 = arith.constant 0 : index
    %c0_104 = arith.constant 0 : index
    %168 = vector.load %arg2[%c48, %c0_103, %c0_104] : memref<64x8x128xf32, #tpu.memory_space<vmem>>, vector<1x8x128xf32>
    %169 = vector.shape_cast %168 : vector<1x8x128xf32> to vector<8x128xf32>
    %c49 = arith.constant 49 : index
    %c0_105 = arith.constant 0 : index
    %c0_106 = arith.constant 0 : index
    %170 = vector.load %arg2[%c49, %c0_105, %c0_106] : memref<64x8x128xf32, #tpu.memory_space<vmem>>, vector<1x8x128xf32>
    %171 = vector.shape_cast %170 : vector<1x8x128xf32> to vector<8x128xf32>
    %172 = arith.select %5, %171, %169 : vector<8x128xi1>, vector<8x128xf32>
    %c50 = arith.constant 50 : index
    %c0_107 = arith.constant 0 : index
    %c0_108 = arith.constant 0 : index
    %173 = vector.load %arg2[%c50, %c0_107, %c0_108] : memref<64x8x128xf32, #tpu.memory_space<vmem>>, vector<1x8x128xf32>
    %174 = vector.shape_cast %173 : vector<1x8x128xf32> to vector<8x128xf32>
    %c51 = arith.constant 51 : index
    %c0_109 = arith.constant 0 : index
    %c0_110 = arith.constant 0 : index
    %175 = vector.load %arg2[%c51, %c0_109, %c0_110] : memref<64x8x128xf32, #tpu.memory_space<vmem>>, vector<1x8x128xf32>
    %176 = vector.shape_cast %175 : vector<1x8x128xf32> to vector<8x128xf32>
    %177 = arith.select %5, %176, %174 : vector<8x128xi1>, vector<8x128xf32>
    %178 = arith.select %9, %177, %172 : vector<8x128xi1>, vector<8x128xf32>
    %c52 = arith.constant 52 : index
    %c0_111 = arith.constant 0 : index
    %c0_112 = arith.constant 0 : index
    %179 = vector.load %arg2[%c52, %c0_111, %c0_112] : memref<64x8x128xf32, #tpu.memory_space<vmem>>, vector<1x8x128xf32>
    %180 = vector.shape_cast %179 : vector<1x8x128xf32> to vector<8x128xf32>
    %c53 = arith.constant 53 : index
    %c0_113 = arith.constant 0 : index
    %c0_114 = arith.constant 0 : index
    %181 = vector.load %arg2[%c53, %c0_113, %c0_114] : memref<64x8x128xf32, #tpu.memory_space<vmem>>, vector<1x8x128xf32>
    %182 = vector.shape_cast %181 : vector<1x8x128xf32> to vector<8x128xf32>
    %183 = arith.select %5, %182, %180 : vector<8x128xi1>, vector<8x128xf32>
    %c54 = arith.constant 54 : index
    %c0_115 = arith.constant 0 : index
    %c0_116 = arith.constant 0 : index
    %184 = vector.load %arg2[%c54, %c0_115, %c0_116] : memref<64x8x128xf32, #tpu.memory_space<vmem>>, vector<1x8x128xf32>
    %185 = vector.shape_cast %184 : vector<1x8x128xf32> to vector<8x128xf32>
    %c55 = arith.constant 55 : index
    %c0_117 = arith.constant 0 : index
    %c0_118 = arith.constant 0 : index
    %186 = vector.load %arg2[%c55, %c0_117, %c0_118] : memref<64x8x128xf32, #tpu.memory_space<vmem>>, vector<1x8x128xf32>
    %187 = vector.shape_cast %186 : vector<1x8x128xf32> to vector<8x128xf32>
    %188 = arith.select %5, %187, %185 : vector<8x128xi1>, vector<8x128xf32>
    %189 = arith.select %9, %188, %183 : vector<8x128xi1>, vector<8x128xf32>
    %190 = arith.select %13, %189, %178 : vector<8x128xi1>, vector<8x128xf32>
    %c56 = arith.constant 56 : index
    %c0_119 = arith.constant 0 : index
    %c0_120 = arith.constant 0 : index
    %191 = vector.load %arg2[%c56, %c0_119, %c0_120] : memref<64x8x128xf32, #tpu.memory_space<vmem>>, vector<1x8x128xf32>
    %192 = vector.shape_cast %191 : vector<1x8x128xf32> to vector<8x128xf32>
    %c57 = arith.constant 57 : index
    %c0_121 = arith.constant 0 : index
    %c0_122 = arith.constant 0 : index
    %193 = vector.load %arg2[%c57, %c0_121, %c0_122] : memref<64x8x128xf32, #tpu.memory_space<vmem>>, vector<1x8x128xf32>
    %194 = vector.shape_cast %193 : vector<1x8x128xf32> to vector<8x128xf32>
    %195 = arith.select %5, %194, %192 : vector<8x128xi1>, vector<8x128xf32>
    %c58 = arith.constant 58 : index
    %c0_123 = arith.constant 0 : index
    %c0_124 = arith.constant 0 : index
    %196 = vector.load %arg2[%c58, %c0_123, %c0_124] : memref<64x8x128xf32, #tpu.memory_space<vmem>>, vector<1x8x128xf32>
    %197 = vector.shape_cast %196 : vector<1x8x128xf32> to vector<8x128xf32>
    %c59 = arith.constant 59 : index
    %c0_125 = arith.constant 0 : index
    %c0_126 = arith.constant 0 : index
    %198 = vector.load %arg2[%c59, %c0_125, %c0_126] : memref<64x8x128xf32, #tpu.memory_space<vmem>>, vector<1x8x128xf32>
    %199 = vector.shape_cast %198 : vector<1x8x128xf32> to vector<8x128xf32>
    %200 = arith.select %5, %199, %197 : vector<8x128xi1>, vector<8x128xf32>
    %201 = arith.select %9, %200, %195 : vector<8x128xi1>, vector<8x128xf32>
    %c60 = arith.constant 60 : index
    %c0_127 = arith.constant 0 : index
    %c0_128 = arith.constant 0 : index
    %202 = vector.load %arg2[%c60, %c0_127, %c0_128] : memref<64x8x128xf32, #tpu.memory_space<vmem>>, vector<1x8x128xf32>
    %203 = vector.shape_cast %202 : vector<1x8x128xf32> to vector<8x128xf32>
    %c61 = arith.constant 61 : index
    %c0_129 = arith.constant 0 : index
    %c0_130 = arith.constant 0 : index
    %204 = vector.load %arg2[%c61, %c0_129, %c0_130] : memref<64x8x128xf32, #tpu.memory_space<vmem>>, vector<1x8x128xf32>
    %205 = vector.shape_cast %204 : vector<1x8x128xf32> to vector<8x128xf32>
    %206 = arith.select %5, %205, %203 : vector<8x128xi1>, vector<8x128xf32>
    %c62 = arith.constant 62 : index
    %c0_131 = arith.constant 0 : index
    %c0_132 = arith.constant 0 : index
    %207 = vector.load %arg2[%c62, %c0_131, %c0_132] : memref<64x8x128xf32, #tpu.memory_space<vmem>>, vector<1x8x128xf32>
    %208 = vector.shape_cast %207 : vector<1x8x128xf32> to vector<8x128xf32>
    %c63 = arith.constant 63 : index
    %c0_133 = arith.constant 0 : index
    %c0_134 = arith.constant 0 : index
    %209 = vector.load %arg2[%c63, %c0_133, %c0_134] : memref<64x8x128xf32, #tpu.memory_space<vmem>>, vector<1x8x128xf32>
    %210 = vector.shape_cast %209 : vector<1x8x128xf32> to vector<8x128xf32>
    %211 = arith.select %5, %210, %208 : vector<8x128xi1>, vector<8x128xf32>
    %212 = arith.select %9, %211, %206 : vector<8x128xi1>, vector<8x128xf32>
    %213 = arith.select %13, %212, %201 : vector<8x128xi1>, vector<8x128xf32>
    %214 = arith.select %17, %213, %190 : vector<8x128xi1>, vector<8x128xf32>
    %215 = arith.select %21, %214, %167 : vector<8x128xi1>, vector<8x128xf32>
    %216 = arith.select %25, %215, %120 : vector<8x128xi1>, vector<8x128xf32>
    %217 = arith.addf %0, %216 : vector<8x128xf32>
    %218 = vector.shape_cast %217 : vector<8x128xf32> to vector<1x8x128xf32>
    %c0_135 = arith.constant 0 : index
    %c0_136 = arith.constant 0 : index
    %c0_137 = arith.constant 0 : index
    %219 = vector.load %arg3[%c0_135, %c0_136, %c0_137] : memref<1x8x128xf32, #tpu.memory_space<vmem>>, vector<1x8x128xf32>
    tpu.vector_store %arg3[%c0_135, %c0_136, %c0_137], %218 {strides = array<i32>} : memref<1x8x128xf32, #tpu.memory_space<vmem>>, vector<1x8x128xf32>,
    return
  }
  func.func @transform_0(%arg0: i32) -> (i32, i32) {
    %c0_i32 = arith.constant 0 : i32
    %c0_i32_0 = arith.constant 0 : i32
    return %arg0, %c0_i32 : i32, i32
  }
  func.func @transform_1(%arg0: i32) -> (i32, i32, i32) {
    %c0_i32 = arith.constant 0 : i32
    %c0_i32_0 = arith.constant 0 : i32
    %c0_i32_1 = arith.constant 0 : i32
    %c0_i32_2 = arith.constant 0 : i32
    return %c0_i32, %c0_i32_0, %c0_i32_1 : i32, i32, i32
  }
  func.func @transform_2(%arg0: i32) -> (i32, i32, i32) {
    %c0_i32 = arith.constant 0 : i32
    %c0_i32_0 = arith.constant 0 : i32
    %c0_i32_1 = arith.constant 0 : i32
    return %arg0, %c0_i32, %c0_i32_0 : i32, i32, i32
  }
}

</mosaic_0001>

<bundles_post_ra>
// kernel: tpu_custom_call.1
= control target key start
LH: loop header
LB: loop body
LE: loop exit
PB: predicated region body
PF: predicated region fallthrough
CT: control target
= control target key end

     0   :  { %7 = vsyncpa [#allocation3], 0  ;;  %s1063_s0 = inlined_call_operand.hbm [shape: s32[16,128], index: 0, kind: input, shape index: {}]   ;;  %s1064_s1 = inlined_call_operand.hbm [shape: f32[64,8,128], index: 1, kind: input, shape index: {}]   ;;  %s1065_s2 = inlined_call_operand.hbm [shape: f32[2,8,128], index: 2, kind: output, shape index: {}]  }
   0x1   :  { %9 = vsyncpa [#allocation3 + $0x1], 0 }
   0x2   :  { %10 = vsyncpa [#allocation6], 0 }
   0x3   :  { %11 = vsyncpa [#allocation4], 0 }
   0x4   :  { %13 = vsyncpa [#allocation4 + $0x1], 0  ;;  %s696_s9 = smov 0   ;;  %s698_s10 = smov 0  }
   0x5   :  { %s700_s11 = smov 0   ;;  %s702_s12 = smov 0  }
   0x6 LB: > { %s717_s13 = sadd.s32 4294967295, %s674_s12   ;;  %s473_s14 = sadd.s32 4294967294, %s674_s12   ;;  %s674_s12 = sphi %s702_s12, %s1095_s12   ;;  %s670_s11 = sphi %s700_s11, %s1094_s11   ;;  %s666_s10 = sphi %s698_s10, %s1093_s10   ;;  %s662_s9 = sphi %s696_s9, %s1092_s9  }
   0x7   : > { %p39_p0 = scmp.ne.s32.totalorder %s666_s10, %s662_s9  ;;  %p1066_p1 = scmp.eq.s32.totalorder %s717_s13, 0 }
   0x8   : > { %p90_p3 = scmp.eq.s32.totalorder %s473_s14, 1  ;;  %p474_p5 = scmp.ge.s32.totalorder %s674_s12, 1 }
   0x9   : > { %p726_p4 = por %p1066_p1, %p39_p0  ;;  %p97_p7 = scmp.lt.s32.totalorder %s674_s12, 3 }
   0xa   : > { %p731_p6 = por %p90_p3, %p39_p0  ;;  %s676_s18 = smov [#allocation5]  }
   0xb   : > { %s1069_s15 = scalar_select %p726_p4, 1, 0 }
   0xc   : > { %s1070_s16 = scalar_select %p731_p6, 1, 0 }
   0xd   : > { %p736_p8 = pnand %p474_p5, %p97_p7  ;;  %s109_s19 = sshll.u32 %s676_s18, 4  ;;  %s740_s19 = int_to_ptr.vmem [resolvable:$true] %s109_s19 }
   0xe   : > { %s752_s21 = sadd.s32 1, %s674_s12   ;;  %s26_s22 = sadd.s32 1, %s670_s11 }
   0xf   : > { %s1071_s17 = scalar_select %p736_p8, 1, 0 }
  0x10   : > { %p495_p9 = pneg %p736_p8  ;;  %s23_s23 = ssub.s32 %s674_s12, %s752_s21 }
  0x11   : > { %s546_s26 = scalar_lea.hbm %s1064_s1, 8192 }
  0x12   : > { %p747_p11 = pnand %p495_p9, %p1066_p1  ;;  %p547_p12 = scmp.ne.s32.totalorder %s1064_s1, %s546_s26 }
  0x13   : > { %p553_p5 = scmp.lt.u32.totalorder %s546_s26, %s1064_s1 }
  0x14   : > { %p548_p13 = pneg %p747_p11 }
  0x16   : > { %p549_p0 = pnand %p548_p13, %p547_p12 }
  0x18   : > { %p550_p3 = pneg %p549_p0 }
  0x1a   : > { %p555_p7 = pnand %p553_p5, %p550_p3 }
  0x1c   : > { %558 = shalt.err (!%p555_p7)
}
  0x1d   : > { %s559_s3 = scalar_lea.vmem %s740_s19, 8192  ;;  %p567_p2 = scmp.lt.s32.totalorder %s740_s19, %s740_s19 }
  0x1e   : > { %p560_p9 = scmp.ne.s32.totalorder %s740_s19, %s559_s3  ;;  %p568_p6 = scmp.lt.s32.totalorder %s559_s3, %s559_s3 }
  0x20   : > { %p562_p10 = pnand %p560_p9, %p548_p13  ;;  %p569_p4 = por %p568_p6, %p567_p2 }
  0x22   : > { %p563_p1 = pneg %p562_p10 }
  0x24   : > { %p570_p8 = pnand %p569_p4, %p563_p1 }
  0x26   : > { %573 = shalt.err (!%p570_p8)
}
  0x27   : > { %s677_s4 = smov 128   ;;  %s678_s5 = smov 8  }
  0x28   : > { %498 = dma.hbm_to_vmem [thread:$0]  (!%p747_p11), %s1064_s1, 8192, %s740_s19, [#allocation6], %s677_s4, %s677_s4, %s678_s5  }
  0x29   : > { %p24_p2 = scmp.eq.s32.totalorder %s23_s23, 0  ;;  %p33_p1 = scmp.ne.s32.totalorder %s670_s11, %s666_s10 }
  0x2a   : > { %p34_p4 = scmp.eq.s32.totalorder %s674_s12, 0  ;;  %p508_p6 = scmp.lt.s32.totalorder %s674_s12, 2 }
  0x2b   : > { %s783_s8 = scalar_select %p24_p2, %s670_s11, %s26_s22  }
  0x2c   : > { %p35_p8 = por %p34_p4, %p33_p1  ;;  %p1073_p10 = scmp.eq.s32.totalorder %s717_s13, 1 }
  0x2d   : > { %s123_s18 = sand.u32 1, %s670_s11   ;;  %s478_s24 = sshll.u32 %s674_s12, 7 }
  0x2e   : > { %p787_p12 = por %p1073_p10, %p33_p1  ;;  %s477_s25 = sshll.u32 %s123_s18, 3 }
  0x2f   : > { %s796_s27 = scalar_lea.hbm %s1063_s0, %s478_s24  ;;  %s127_s19 = scalar_lea.vmem [#allocation2], %s477_s25 }
  0x30   : > { %s134_s22 = sshll.u32 %s127_s19, 4  ;;  %p798_p11 = pnand %p508_p6, %p35_p8  ;;  %s802_s22 = int_to_ptr.vmem [resolvable:$true] %s134_s22 }
  0x31   : > { %s124_s28 = scalar_lea.sflag [#allocation3], %s123_s18  ;;  %s574_s29 = scalar_lea.hbm %s796_s27, 128 }
  0x32   : > { %p575_p13 = scmp.ne.s32.totalorder %s796_s27, %s574_s29  ;;  %p576_p0 = pneg %p798_p11 }
  0x33   : > { %s579_s4 = scalar_lea.hbm %s1063_s0, 256  ;;  %p580_p7 = scmp.lt.u32.totalorder %s796_s27, %s1063_s0 }
  0x34   : > { %p577_p3 = pnand %p576_p0, %p575_p13  ;;  %p581_p9 = scmp.lt.u32.totalorder %s579_s4, %s574_s29 }
  0x35   : > { %p583_p1 = scmp.lt.u32.totalorder %s574_s29, %s796_s27 }
  0x36   : > { %p578_p5 = pneg %p577_p3  ;;  %p582_p2 = por %p581_p9, %p580_p7 }
  0x38   : > { %p584_p4 = por %p583_p1, %p582_p2 }
  0x3a   : > { %p585_p6 = pnand %p584_p4, %p578_p5 }
  0x3c   : > { %588 = shalt.err (!%p585_p6)
}
  0x3d   : > { %s589_s7 = scalar_lea.vmem %s802_s22, 128  ;;  %s679_s18 = smov [#allocation2]  }
  0x3e   : > { %p590_p8 = scmp.ne.s32.totalorder %s802_s22, %s589_s7  ;;  %s594_s24 = sshll.u32 %s679_s18, 4  ;;  %s595_s24 = int_to_ptr.vmem [resolvable:$false] %s594_s24 }
  0x3f   : > { %s596_s25 = scalar_lea.vmem %s595_s24, 256  ;;  %p597_p3 = scmp.lt.s32.totalorder %s802_s22, %s595_s24 }
  0x40   : > { %p592_p10 = pnand %p590_p8, %p576_p0  ;;  %p598_p7 = scmp.lt.s32.totalorder %s596_s25, %s589_s7 }
  0x42   : > { %p593_p13 = pneg %p592_p10  ;;  %p599_p9 = por %p598_p7, %p597_p3 }
  0x44   : > { %p600_p2 = pnand %p599_p9, %p593_p13 }
  0x46   : > { %603 = shalt.err (!%p600_p2)
}
  0x47   : > { %502 = dma.hbm_to_vmem [thread:$0]  (!%p798_p11), %s796_s27, 128, %s802_s22, %s124_s28  }
  0x48   : > { %p1076_p5 = scmp.ne.s32.totalorder %s1071_s17, 0 }
  0x49   : > { %s832_s20 = sand.u32 (!%p1076_p5), 1, %s666_s10   ;;  %p1077_p0 = scmp.ne.s32.totalorder (!%p1076_p5), %s1069_s15, 0 }
  0x4a   : > { %143 = sbr.rel (%p1076_p5) target bundleno = 127 (0x7f), region = 28  ;;  %s480_s26 = sshll.u32 (!%p1076_p5), %s832_s20, 3 }
  0x4b   : > { %s146_s19 = scalar_lea.sflag (!%p1076_p5), [#allocation3], %s832_s20  ;;  %s149_s29 = scalar_lea.vmem (!%p1076_p5), [#allocation2], %s480_s26 }
  0x51   : > { %649 = dma.done.wait (%p1077_p0), %s146_s19, 128  }
  0x52   : > { %651 = vsyncadd (%p1077_p0), %s146_s19, 4294967168  ;;  %p1078_p11 = scmp.eq.s32.totalorder %s717_s13, 0 }
  0x54   : > { %653 = dma.done.wait (%p1078_p11), [#allocation6], 8192   ;;  %p1079_p1 = pmov %p1078_p11 }
  0x55   : > { %v846_v0 = vld [vmem:[%s149_s29] sm:$0xff]  ;;  %v187_v1 = vld [vmem:[#allocation5] sm:$0xff]  ;;  %v189_v4 = vld [vmem:[#allocation5 + $0x8] sm:$0xff]  ;;  %s173_s15 = scalar_lea.vmem [#allocation7], %s480_s26  ;;  %s484_s27 = sshll.u32 %s717_s13, 7 }
  0x56   : > { %655 = vsyncadd (%p1079_p1), [#allocation6], 4294959104  ;;  %v175_v2 = vand.u32 1, %v846_v0  ;;  %v177_v3 = vand.u32 2, %v846_v0  ;;  %v192_v5 = vld [vmem:[#allocation5 + $0x10] sm:$0xff]  ;;  %v194_v6 = vld [vmem:[#allocation5 + $0x18] sm:$0xff]  ;;  %s1021_s13 = scalar_lea.hbm %s1065_s2, %s484_s27 }
  0x57   : > { %v198_v7 = vld [vmem:[#allocation5 + $0x20] sm:$0xff]  ;;  %v200_v8 = vld [vmem:[#allocation5 + $0x28] sm:$0xff]  ;;  %v203_v9 = vld [vmem:[#allocation5 + $0x30] sm:$0xff]  ;;  %v179_v13 = vand.u32 4, %v846_v0  ;;  %v181_v26 = vand.u32 8, %v846_v0  ;;  %v183_v41 = vand.u32 16, %v846_v0 }
  0x58   : > { %vm850_vm0 = vcmp.ne.s32.totalorder %v175_v2, 0  ;;  %v205_v11 = vld [vmem:[#allocation5 + $0x38] sm:$0xff]  ;;  %vm854_vm1 = vcmp.ne.s32.totalorder %v177_v3, 0  ;;  %v210_v18 = vld [vmem:[#allocation5 + $0x40] sm:$0xff]  ;;  %v212_v19 = vld [vmem:[#allocation5 + $0x48] sm:$0xff]  ;;  %v185_v42 = vand.u32 32, %v846_v0 }
  0x59   : > { %v190_v14 = vsel %vm850_vm0, %v189_v4, %v187_v1  ;;  %v195_v15 = vsel %vm850_vm0, %v194_v6, %v192_v5  ;;  %v201_v16 = vsel %vm850_vm0, %v200_v8, %v198_v7  ;;  %v206_v17 = vsel %vm850_vm0, %v205_v11, %v203_v9  ;;  %v215_v20 = vld [vmem:[#allocation5 + $0x50] sm:$0xff]  ;;  %v217_v21 = vld [vmem:[#allocation5 + $0x58] sm:$0xff]  ;;  %v221_v22 = vld [vmem:[#allocation5 + $0x60] sm:$0xff]  ;;  %s393_s17 = sshll.u32 %s173_s15, 4  ;;  %s380_s28 = scalar_lea.sflag [#allocation4], %s832_s20  ;;  %s1016_s17 = int_to_ptr.vmem [resolvable:$true] %s393_s17 }
  0x5a   : > { %v223_v23 = vld [vmem:[#allocation5 + $0x68] sm:$0xff]  ;;  %v226_v24 = vld [vmem:[#allocation5 + $0x70] sm:$0xff]  ;;  %v228_v25 = vld [vmem:[#allocation5 + $0x78] sm:$0xff]  ;;  %vm868_vm2 = vcmp.ne.s32.totalorder %v179_v13, 0  ;;  %v874_v33 = vsel %vm854_vm1, %v195_v15, %v190_v14  ;;  %v878_v34 = vsel %vm854_vm1, %v206_v17, %v201_v16  ;;  %v213_v43 = vsel %vm850_vm0, %v212_v19, %v210_v18  ;;  %s604_s30 = scalar_lea.vmem %s1016_s17, 128  ;;  %s680_s3 = smov [#allocation7]  }
  0x5b   : > { %v234_v27 = vld [vmem:[#allocation5 + $0x80] sm:$0xff]  ;;  %v236_v28 = vld [vmem:[#allocation5 + $0x88] sm:$0xff]  ;;  %v239_v29 = vld [vmem:[#allocation5 + $0x90] sm:$0xff]  ;;  %vm884_vm3 = vcmp.ne.s32.totalorder %v181_v26, 0  ;;  %v208_v48 = vsel %vm868_vm2, %v878_v34, %v874_v33  ;;  %v218_v49 = vsel %vm850_vm0, %v217_v21, %v215_v20  ;;  %v224_v50 = vsel %vm850_vm0, %v223_v23, %v221_v22  ;;  %p605_p4 = scmp.ne.s32.totalorder %s1016_s17, %s604_s30  ;;  %s608_s4 = sshll.u32 %s680_s3, 4  ;;  %s609_s4 = int_to_ptr.vmem [resolvable:$false] %s608_s4 }
  0x5c   : > { %v241_v30 = vld [vmem:[#allocation5 + $0x98] sm:$0xff]  ;;  %v245_v31 = vld [vmem:[#allocation5 + $0xa0] sm:$0xff]  ;;  %v247_v35 = vld [vmem:[#allocation5 + $0xa8] sm:$0xff]  ;;  %v229_v51 = vsel %vm850_vm0, %v228_v25, %v226_v24  ;;  %v237_v55 = vsel %vm850_vm0, %v236_v28, %v234_v27  ;;  %v219_v6 = vsel %vm854_vm1, %v218_v49, %v213_v43  ;;  %vm964_vm4 = vcmp.ne.s32.totalorder %v183_v41, 0  ;;  %s610_s5 = scalar_lea.vmem %s609_s4, 256  ;;  %p611_p10 = scmp.lt.s32.totalorder %s1016_s17, %s609_s4 }
  0x5d   : > { %v250_v36 = vld [vmem:[#allocation5 + $0xb0] sm:$0xff]  ;;  %v252_v37 = vld [vmem:[#allocation5 + $0xb8] sm:$0xff]  ;;  %v257_v38 = vld [vmem:[#allocation5 + $0xc0] sm:$0xff]  ;;  %v242_v56 = vsel %vm850_vm0, %v241_v30, %v239_v29  ;;  %v248_v57 = vsel %vm850_vm0, %v247_v35, %v245_v31  ;;  %v230_v15 = vsel %vm854_vm1, %v229_v51, %v224_v50  ;;  %vm186_vm5 = vcmp.ne.s32.totalorder %v185_v42, 0  ;;  %p606_p6 = pnand %p605_p4, %p787_p12  ;;  %p612_p13 = scmp.lt.s32.totalorder %s610_s5, %s604_s30 }
  0x5e   : > { %v259_v39 = vld [vmem:[#allocation5 + $0xc8] sm:$0xff]  ;;  %v262_v40 = vld [vmem:[#allocation5 + $0xd0] sm:$0xff]  ;;  %v264_v44 = vld [vmem:[#allocation5 + $0xd8] sm:$0xff]  ;;  %v253_v58 = vsel %vm850_vm0, %v252_v37, %v250_v36  ;;  %v243_v16 = vsel %vm854_vm1, %v242_v56, %v237_v55 }
  0x5f   : > { %v268_v45 = vld [vmem:[#allocation5 + $0xe0] sm:$0xff]  ;;  %v270_v46 = vld [vmem:[#allocation5 + $0xe8] sm:$0xff]  ;;  %v273_v52 = vld [vmem:[#allocation5 + $0xf0] sm:$0xff]  ;;  %v260_v62 = vsel %vm850_vm0, %v259_v39, %v257_v38  ;;  %v265_v63 = vsel %vm850_vm0, %v264_v44, %v262_v40  ;;  %v254_v22 = vsel %vm854_vm1, %v253_v58, %v248_v57  ;;  %v231_v39 = vsel %vm868_vm2, %v230_v15, %v219_v6  ;;  %p607_p8 = pneg %p606_p6  ;;  %p613_p3 = por %p612_p13, %p611_p10 }
  0x60   : > { %v275_v53 = vld [vmem:[#allocation5 + $0xf8] sm:$0xff]  ;;  %v282_v54 = vld [vmem:[#allocation5 + $0x100] sm:$0xff]  ;;  %v284_v59 = vld [vmem:[#allocation5 + $0x108] sm:$0xff]  ;;  %v271_v1 = vsel %vm850_vm0, %v270_v46, %v268_v45  ;;  %v266_v23 = vsel %vm854_vm1, %v265_v63, %v260_v62  ;;  %v255_v50 = vsel %vm868_vm2, %v254_v22, %v243_v16 }
  0x61   : > { %v287_v60 = vld [vmem:[#allocation5 + $0x110] sm:$0xff]  ;;  %v289_v61 = vld [vmem:[#allocation5 + $0x118] sm:$0xff]  ;;  %v276_v2 = vsel %vm850_vm0, %v275_v53, %v273_v52  ;;  %v293_v3 = vld [vmem:[#allocation5 + $0x120] sm:$0xff]  ;;  %v285_v7 = vsel %vm850_vm0, %v284_v59, %v282_v54  ;;  %p614_p7 = pnand %p613_p3, %p607_p8 }
  0x62   : > { %v295_v4 = vld [vmem:[#allocation5 + $0x128] sm:$0xff]  ;;  %v298_v5 = vld [vmem:[#allocation5 + $0x130] sm:$0xff]  ;;  %v290_v8 = vsel %vm850_vm0, %v289_v61, %v287_v60  ;;  %v300_v11 = vld [vmem:[#allocation5 + $0x138] sm:$0xff]  ;;  %v277_v24 = vsel %vm854_vm1, %v276_v2, %v271_v1 }
  0x63   : > { %v296_v9 = vsel %vm850_vm0, %v295_v4, %v293_v3  ;;  %v305_v13 = vld [vmem:[#allocation5 + $0x140] sm:$0xff]  ;;  %v307_v14 = vld [vmem:[#allocation5 + $0x148] sm:$0xff]  ;;  %v301_v17 = vsel %vm850_vm0, %v300_v11, %v298_v5  ;;  %v310_v19 = vld [vmem:[#allocation5 + $0x150] sm:$0xff]  ;;  %v291_v29 = vsel %vm854_vm1, %v290_v8, %v285_v7  ;;  %v278_v51 = vsel %vm868_vm2, %v277_v24, %v266_v23 }
  0x64   : > { %v308_v18 = vsel %vm850_vm0, %v307_v14, %v305_v13  ;;  %v312_v20 = vld [vmem:[#allocation5 + $0x158] sm:$0xff]  ;;  %v316_v21 = vld [vmem:[#allocation5 + $0x160] sm:$0xff]  ;;  %v318_v26 = vld [vmem:[#allocation5 + $0x168] sm:$0xff]  ;;  %v302_v30 = vsel %vm854_vm1, %v301_v17, %v296_v9  ;;  %v232_v7 = vsel %vm884_vm3, %v231_v39, %v208_v48  ;;  %v279_v8 = vsel %vm884_vm3, %v278_v51, %v255_v50 }
  0x65   : > { %v313_v25 = vsel %vm850_vm0, %v312_v20, %v310_v19  ;;  %v321_v27 = vld [vmem:[#allocation5 + $0x170] sm:$0xff]  ;;  %v323_v28 = vld [vmem:[#allocation5 + $0x178] sm:$0xff]  ;;  %v319_v31 = vsel %vm850_vm0, %v318_v26, %v316_v21  ;;  %v329_v36 = vld [vmem:[#allocation5 + $0x180] sm:$0xff]  ;;  %v303_v58 = vsel %vm868_vm2, %v302_v30, %v291_v29  ;;  %v280_v15 = vsel %vm964_vm4, %v279_v8, %v232_v7 }
  0x66   : > { %v324_v35 = vsel %vm850_vm0, %v323_v28, %v321_v27  ;;  %v331_v37 = vld [vmem:[#allocation5 + $0x188] sm:$0xff]  ;;  %v334_v38 = vld [vmem:[#allocation5 + $0x190] sm:$0xff]  ;;  %v314_v40 = vsel %vm854_vm1, %v313_v25, %v308_v18  ;;  %v336_v45 = vld [vmem:[#allocation5 + $0x198] sm:$0xff] }
  0x67   : > { %v325_v43 = vsel %vm854_vm1, %v324_v35, %v319_v31  ;;  %v332_v44 = vsel %vm850_vm0, %v331_v37, %v329_v36  ;;  %v340_v46 = vld [vmem:[#allocation5 + $0x1a0] sm:$0xff]  ;;  %v342_v49 = vld [vmem:[#allocation5 + $0x1a8] sm:$0xff]  ;;  %v337_v52 = vsel %vm850_vm0, %v336_v45, %v334_v38  ;;  %v345_v54 = vld [vmem:[#allocation5 + $0x1b0] sm:$0xff] }
  0x68   : > { %v343_v53 = vsel %vm850_vm0, %v342_v49, %v340_v46  ;;  %v347_v55 = vld [vmem:[#allocation5 + $0x1b8] sm:$0xff]  ;;  %v352_v56 = vld [vmem:[#allocation5 + $0x1c0] sm:$0xff]  ;;  %v338_v59 = vsel %vm854_vm1, %v337_v52, %v332_v44  ;;  %v354_v61 = vld [vmem:[#allocation5 + $0x1c8] sm:$0xff]  ;;  %v326_v1 = vsel %vm868_vm2, %v325_v43, %v314_v40 }
  0x69   : > { %v348_v60 = vsel %vm850_vm0, %v347_v55, %v345_v54  ;;  %v357_v62 = vld [vmem:[#allocation5 + $0x1d0] sm:$0xff]  ;;  %v359_v63 = vld [vmem:[#allocation5 + $0x1d8] sm:$0xff]  ;;  %v355_v2 = vsel %vm850_vm0, %v354_v61, %v352_v56  ;;  %v363_v4 = vld [vmem:[#allocation5 + $0x1e0] sm:$0xff]  ;;  %v327_v34 = vsel %vm884_vm3, %v326_v1, %v303_v58 }
  0x6a   : > { %v349_v41 = vsel %vm854_vm1, %v348_v60, %v343_v53  ;;  %v360_v3 = vsel %vm850_vm0, %v359_v63, %v357_v62  ;;  %v365_v5 = vld [vmem:[#allocation5 + $0x1e8] sm:$0xff]  ;;  %v368_v6 = vld [vmem:[#allocation5 + $0x1f0] sm:$0xff]  ;;  %v370_v13 = vld [vmem:[#allocation5 + $0x1f8] sm:$0xff] }
  0x6b   : > { %v361_v9 = vsel %vm854_vm1, %v360_v3, %v355_v2  ;;  %v366_v11 = vsel %vm850_vm0, %v365_v5, %v363_v4  ;;  %v350_v14 = vsel %vm868_vm2, %v349_v41, %v338_v59  ;;  %v371_v33 = vsel %vm850_vm0, %v370_v13, %v368_v6 }
  0x6c   : > { %v372_v48 = vsel %vm854_vm1, %v371_v33, %v366_v11 }
  0x6d   : > { %v373_v10 = vsel %vm868_vm2, %v372_v48, %v361_v9 }
  0x6e   : > { %v374_v16 = vsel %vm884_vm3, %v373_v10, %v350_v14 }
  0x6f   : > { %v375_v12 = vsel %vm964_vm4, %v374_v16, %v327_v34 }
  0x70   : > { %v376_v0 = vsel %vm186_vm5, %v375_v12, %v280_v15 }
  0x71   : > { %378 = vst [vmem:[%s173_s15] sm:$0xff] %v376_v0 }
  0x72   : > { %617 = shalt.err (!%p614_p7)
}
  0x73   : > { %s618_s6 = scalar_lea.hbm %s1021_s13, 128  ;;  %s622_s24 = scalar_lea.hbm %s1065_s2, 256 }
  0x74   : > { %p619_p9 = scmp.ne.s32.totalorder %s1021_s13, %s618_s6  ;;  %p623_p0 = scmp.lt.u32.totalorder %s1021_s13, %s1065_s2 }
  0x75   : > { %p624_p11 = scmp.lt.u32.totalorder %s622_s24, %s618_s6  ;;  %p626_p4 = scmp.lt.u32.totalorder %s618_s6, %s1021_s13 }
  0x76   : > { %p620_p2 = pnand %p619_p9, %p787_p12 }
  0x77   : > { %p625_p1 = por %p624_p11, %p623_p0 }
  0x78   : > { %p621_p5 = pneg %p620_p2 }
  0x79   : > { %p627_p6 = por %p626_p4, %p625_p1 }
  0x7b   : > { %p628_p8 = pnand %p627_p6, %p621_p5 }
  0x7d   : > { %631 = shalt.err (!%p628_p8)
}
  0x7e   : > { %493 = dma.vmem_to_hbm [thread:$0]  (%p787_p12), %s1016_s17, 128, %s1021_s13, %s380_s28  }
  0x7f PF: > { %s405_s26 = sand.u32 1, %s662_s9   ;;  %p1090_p10 = scmp.ne.s32.totalorder %s1070_s16, 0 }
  0x80   : > { %p1091_p13 = scmp.ge.s32.totalorder %s674_s12, 2  ;;  %s406_s19 = scalar_lea.sflag [#allocation4], %s405_s26 }
  0x82   : > { %p504_p3 = pnand %p1091_p13, %p1090_p10 }
  0x84   : > { %657 = dma.done.wait (!%p504_p3), %s406_s19, 128  }
  0x85   : > { %659 = vsyncadd (!%p504_p3), %s406_s19, 4294967168  ;;  %p16_p7 = scmp.ge.s32.totalorder %s752_s21, 4   ;;  %s1092_s9 = smov %s666_s10 }
  0x86   : > { %s1093_s10 = smov %s670_s11  ;;  %s1094_s11 = smov %s783_s8 }
  0x87   : > { %s1095_s12 = smov %s752_s21  ;;  %18 = sbr.rel (!%p16_p7) target bundleno = 6 (0x6), region = 140 }
  0x8e   :  { %411 = vsyncpa [#allocation3], 1 }
  0x8f   :  { %413 = vsyncpa [#allocation3 + $0x1], 1 }
  0x90   :  { %414 = vsyncpa [#allocation6], 1 }
  0x91   :  { %415 = vsyncpa [#allocation4], 1 }
  0x92   :  { %417 = vsyncpa [#allocation4 + $0x1], 1 }

</bundles_post_ra>
